<compile_context>
chip_gen: v7x
topology: tpu7x:2x2x1
jax: 0.10.0
libtpu: 0.0.40
codegen_flags: <defaults>
</compile_context>

<pallas_src>
import functools
import math

import jax
import jax.numpy as jnp
from jax.experimental import pallas as pl
from jax.experimental.pallas import tpu as pltpu


def _combined_loss_kernel(x_ref, t_ref,
                          bce_out, inter_out, psum_out, tsum_out,
                          bce_acc, inter_acc, p_acc, t_acc,
                          *, pos_weight, td, tiles_per_split, d2, num_tiles,
                          mask_needed):
    j = pl.program_id(1)

    @pl.when(j == 0)
    def _init():
        bce_acc[...] = jnp.zeros_like(bce_acc)
        inter_acc[...] = jnp.zeros_like(inter_acc)
        p_acc[...] = jnp.zeros_like(p_acc)
        t_acc[...] = jnp.zeros_like(t_acc)

    # Inputs stream in their native dtype; cast per-tile, accumulate in f32.
    x = x_ref[...].astype(jnp.float32)          # (rows, TD)
    t = t_ref[...].astype(jnp.float32)          # (rows, TD)

    # One shared exponential feeds both softplus(-x) and sigmoid(x).
    e = jnp.exp(-jnp.abs(x))                    # exp(-|x|) in (0, 1]
    den = 1.0 + e                               # in (1, 2]
    # softplus(-x) = max(-x, 0) + log(1 + e); e >= tiny => log(1+e) is safe.
    sp_neg_x = jnp.maximum(-x, 0.0) + jnp.log(den)
    # BCEWithLogits w/ pos_weight: (1-t)*x + (1 + (pw-1)*t) * softplus(-x)
    bce_elem = (1.0 - t) * x + (1.0 + (pos_weight - 1.0) * t) * sp_neg_x
    # sigmoid(x): EUP approx reciprocal + 1 Newton-Raphson step (~f32 exact).
    r = pl.reciprocal(den, approx=True)
    r = r * (2.0 - den * r)
    p = jnp.where(x >= 0.0, 1.0, e) * r

    def _accumulate(bce_e, pp, tt):
        # Lane-reduce only; keep per-row (rows, 1) partials in VMEM scratch.
        bce_acc[...] += jnp.sum(bce_e, axis=1, keepdims=True)
        inter_acc[...] += jnp.sum(pp * tt, axis=1, keepdims=True)
        p_acc[...] += jnp.sum(pp, axis=1, keepdims=True)
        t_acc[...] += jnp.sum(tt, axis=1, keepdims=True)

    if not mask_needed:
        # Statically mask-free path (td divides d2): zero masking overhead.
        _accumulate(bce_elem, p, t)
    else:
        # Only the single ragged tail tile pays for the mask.
        blk = pl.program_id(0) * tiles_per_split + j
        is_tail = blk == num_tiles - 1

        @pl.when(jnp.logical_not(is_tail))
        def _full_tile():
            _accumulate(bce_elem, p, t)

        @pl.when(is_tail)
        def _tail_tile():
            col = blk * td + jax.lax.broadcasted_iota(jnp.int32, x.shape, 1)
            valid = col < d2
            # select (not multiply-by-0) so padded garbage/NaN is discarded.
            _accumulate(jnp.where(valid, bce_elem, 0.0),
                        jnp.where(valid, p, 0.0),
                        jnp.where(valid, t, 0.0))

    @pl.when(j == pl.num_programs(1) - 1)
    def _finalize():
        bce_out[0] = bce_acc[...]
        inter_out[0] = inter_acc[...]
        psum_out[0] = p_acc[...]
        tsum_out[0] = t_acc[...]


def _has_two_tensorcores():
    """True only on chips where a 'parallel' grid axis shards across 2 TCs."""
    try:
        kind = jax.devices()[0].device_kind.lower()
    except Exception:
        return False
    return "v7" in kind


def combined_loss(logits, targets, *, pos_weight=2.0, bce_weight=1.0,
                  dice_weight=1.0, dice_smooth=1e-6,
                  target_block_bytes=4 << 20):
    """logits, targets: (N, C, H, W) in any float dtype.  Returns f32 scalar."""
    n = logits.shape[0]
    d = 1
    for sdim in logits.shape[1:]:
        d *= sdim

    # --- sublane packing: (N, D) -> (N*R, D/R), free contiguous reshape -----
    r_pack = 1
    if n % 8 != 0:
        cand = 8 // math.gcd(n, 8)              # smallest R with (N*R) % 8 == 0
        if d % cand == 0:
            r_pack = cand
    rows = n * r_pack
    d2 = d // r_pack

    # Flatten only; NO dtype pre-cast in the wrapper (cast happens per-tile).
    x = logits.reshape(rows, d2)
    t = targets.reshape(rows, d2)

    # --- tile sizing: lane-aligned, ~target_block_bytes per input block -----
    itemsize = max(x.dtype.itemsize, t.dtype.itemsize)
    lanes = max(128, (int(target_block_bytes) // (rows * itemsize)) // 128 * 128)
    td = d2 if d2 <= lanes else lanes
    num_tiles = pl.cdiv(d2, td)
    mask_needed = (num_tiles * td) != d2        # only ragged tails need a mask

    # 2-way TensorCore split only on 2-TC chips, with enough tiles to pipeline
    # and an even tile count (no clamped duplicate tiles, no extra masking).
    n_splits = 2 if (_has_two_tensorcores()
                     and num_tiles >= 8 and num_tiles % 2 == 0) else 1
    tiles_per_split = num_tiles // n_splits

    def in_index_map(s, j):
        return (0, s * tiles_per_split + j)

    kernel = functools.partial(
        _combined_loss_kernel,
        pos_weight=float(pos_weight),
        td=td,
        tiles_per_split=tiles_per_split,
        d2=d2,
        num_tiles=num_tiles,
        mask_needed=mask_needed,
    )

    part_shape = jax.ShapeDtypeStruct((n_splits, rows, 1), jnp.float32)
    part_spec = pl.BlockSpec((1, rows, 1), lambda s, j: (s, 0, 0))

    cost = pl.CostEstimate(
        flops=20 * n * d,
        transcendentals=3 * n * d,
        bytes_accessed=(x.size * x.dtype.itemsize
                        + t.size * t.dtype.itemsize
                        + 4 * n_splits * rows * 4),
    )

    bce_p, inter_p, psum_p, tsum_p = pl.pallas_call(
        kernel,
        out_shape=(part_shape, part_shape, part_shape, part_shape),
        grid_spec=pltpu.PrefetchScalarGridSpec(
            num_scalar_prefetch=0,
            grid=(n_splits, tiles_per_split),
            in_specs=[
                pl.BlockSpec((rows, td), in_index_map),
                pl.BlockSpec((rows, td), in_index_map),
            ],
            out_specs=(part_spec, part_spec, part_spec, part_spec),
            scratch_shapes=[pltpu.VMEM((rows, 1), jnp.float32)
                            for _ in range(4)],
        ),
        compiler_params=pltpu.CompilerParams(
            dimension_semantics=("parallel", "arbitrary"),
            vmem_limit_bytes=48 << 20),
        cost_estimate=cost,
    )(x, t)

    # Tiny O(N) combine: sum across TC splits and packed-row groups, then the
    # nonlinear Dice ratio + weighting (cannot be fused across D-splits).
    bce = jnp.sum(bce_p) / float(n * d)
    inter = jnp.sum(inter_p.reshape(n_splits, n, r_pack), axis=(0, 2))
    psum = jnp.sum(psum_p.reshape(n_splits, n, r_pack), axis=(0, 2))
    tsum = jnp.sum(tsum_p.reshape(n_splits, n, r_pack), axis=(0, 2))
    dice_coeff = (2.0 * inter + dice_smooth) / (psum + tsum + dice_smooth)
    dice = 1.0 - jnp.mean(dice_coeff)
    return bce_weight * bce + dice_weight * dice


def _reference_combined_loss(logits, targets, pos_weight, bce_weight,
                             dice_weight, smooth):
    """Pure-JAX reference mirroring the PyTorch module."""
    x = logits.reshape(logits.shape[0], -1).astype(jnp.float32)
    t = targets.reshape(targets.shape[0], -1).astype(jnp.float32)
    sp_neg_x = jnp.maximum(-x, 0.0) + jnp.log1p(jnp.exp(-jnp.abs(x)))
    bce = jnp.mean((1.0 - t) * x + (1.0 + (pos_weight - 1.0) * t) * sp_neg_x)
    p = jax.nn.sigmoid(x)
    inter = jnp.sum(p * t, axis=1)
    dice_coeff = (2.0 * inter + smooth) / (jnp.sum(p, axis=1) +
                                           jnp.sum(t, axis=1) + smooth)
    dice = 1.0 - jnp.mean(dice_coeff)
    return bce_weight * bce + dice_weight * dice


def _check(logits, targets, **kw):
    ref = _reference_combined_loss(logits, targets, kw["pos_weight"],
                                   kw["bce_weight"], kw["dice_weight"],
                                   kw["dice_smooth"])
    out = jax.block_until_ready(combined_loss(logits, targets, **kw))
    assert jnp.allclose(out, ref, rtol=1e-5, atol=1e-5), (out, ref)


if __name__ == "__main__":
    key = jax.random.PRNGKey(0)
    k1, k2, k3, k4, k5, k6 = jax.random.split(key, 6)

    params = dict(pos_weight=3.0, bce_weight=1.0, dice_weight=1.0,
                  dice_smooth=1e-6)

    # 1) Base case: N=2, C=1, H=W=16 (D=256) -> sublane-packed single tile.
    N, C, H, W = 2, 1, 16, 16
    logits = jax.random.normal(k1, (N, C, H, W), dtype=jnp.float32) * 2.0
    targets = (jax.random.uniform(k2, (N, C, H, W)) > 0.5).astype(jnp.float32)
    _check(logits, targets, **params)

    # 2) Force multi-tile streaming with NO masking (td divides packed D).
    logits_b = jax.random.normal(k3, (2, 1, 32, 32), dtype=jnp.float32) * 2.0
    targets_b = (jax.random.uniform(k4, (2, 1, 32, 32)) > 0.5).astype(jnp.float32)
    _check(logits_b, targets_b, target_block_bytes=1024, **params)

    # 3) Ragged packed D (144 = 128 + 16): exercises the pl.when tail-mask path.
    logits_r = jax.random.normal(k5, (2, 1, 16, 36), dtype=jnp.float32) * 2.0
    targets_r = (jax.random.uniform(k6, (2, 1, 16, 36)) > 0.5).astype(jnp.float32)
    _check(logits_r, targets_r, target_block_bytes=1024, **params)

    # 4) Narrow-dtype streaming: bf16 logits cast to f32 inside the kernel.
    _check(logits.astype(jnp.bfloat16), targets, **params)

    # 5) Batch already a multiple of 8: no row packing needed.
    logits8 = jnp.tile(logits, (4, 1, 1, 1))
    targets8 = jnp.tile(targets, (4, 1, 1, 1))
    _check(logits8, targets8, **params)

    print("KERNEL_OK")
</pallas_src>

<mosaic_0001>
module attributes {stable_mosaic.version = 11 : i64} {
  func.func @_combined_loss_kernel(%arg0: i32, %arg1: i32, %arg2: memref<8x64xf32, #tpu.memory_space<vmem>>, %arg3: memref<8x64xf32, #tpu.memory_space<vmem>>, %arg4: memref<1x8x1xf32, #tpu.memory_space<vmem>>, %arg5: memref<1x8x1xf32, #tpu.memory_space<vmem>>, %arg6: memref<1x8x1xf32, #tpu.memory_space<vmem>>, %arg7: memref<1x8x1xf32, #tpu.memory_space<vmem>>, %arg8: memref<8x1xf32, #tpu.memory_space<vmem>>, %arg9: memref<8x1xf32, #tpu.memory_space<vmem>>, %arg10: memref<8x1xf32, #tpu.memory_space<vmem>>, %arg11: memref<8x1xf32, #tpu.memory_space<vmem>>) attributes {dimension_semantics = [#tpu.dimension_semantics<parallel>, #tpu.dimension_semantics<arbitrary>], iteration_bounds = array<i64: 1, 1>, scalar_prefetch = 0 : i64, scratch_operands = 4 : i64, tpu.core_type = #tpu.core_type<tc>, window_params = [{transform_indices = @transform_0, window_bounds = array<i64: 8, 64>}, {transform_indices = @transform_1, window_bounds = array<i64: 8, 64>}, {transform_indices = @transform_2, window_bounds = array<i64: 1, 8, 1>}, {transform_indices = @transform_3, window_bounds = array<i64: 1, 8, 1>}, {transform_indices = @transform_4, window_bounds = array<i64: 1, 8, 1>}, {transform_indices = @transform_5, window_bounds = array<i64: 1, 8, 1>}]} {
    %c0_i32 = arith.constant 0 : i32
    %0 = arith.cmpi eq, %arg1, %c0_i32 : i32
    %1 = arith.extui %0 : i1 to i32
    %c0_i32_0 = arith.constant 0 : i32
    %2 = arith.cmpi ne, %1, %c0_i32_0 : i32
    scf.if %2 {
      %cst_35 = arith.constant 0.000000e+00 : f32
      %60 = vector.broadcast %cst_35 : f32 to vector<8x1xf32>
      %c0_36 = arith.constant 0 : index
      %c0_37 = arith.constant 0 : index
      %61 = vector.load %arg8[%c0_36, %c0_37] : memref<8x1xf32, #tpu.memory_space<vmem>>, vector<8x1xf32>
      tpu.vector_store %arg8[%c0_36, %c0_37], %60 {strides = array<i32>} : memref<8x1xf32, #tpu.memory_space<vmem>>, vector<8x1xf32>,
      %cst_38 = arith.constant 0.000000e+00 : f32
      %62 = vector.broadcast %cst_38 : f32 to vector<8x1xf32>
      %c0_39 = arith.constant 0 : index
      %c0_40 = arith.constant 0 : index
      %63 = vector.load %arg9[%c0_39, %c0_40] : memref<8x1xf32, #tpu.memory_space<vmem>>, vector<8x1xf32>
      tpu.vector_store %arg9[%c0_39, %c0_40], %62 {strides = array<i32>} : memref<8x1xf32, #tpu.memory_space<vmem>>, vector<8x1xf32>,
      %cst_41 = arith.constant 0.000000e+00 : f32
      %64 = vector.broadcast %cst_41 : f32 to vector<8x1xf32>
      %c0_42 = arith.constant 0 : index
      %c0_43 = arith.constant 0 : index
      %65 = vector.load %arg10[%c0_42, %c0_43] : memref<8x1xf32, #tpu.memory_space<vmem>>, vector<8x1xf32>
      tpu.vector_store %arg10[%c0_42, %c0_43], %64 {strides = array<i32>} : memref<8x1xf32, #tpu.memory_space<vmem>>, vector<8x1xf32>,
      %cst_44 = arith.constant 0.000000e+00 : f32
      %66 = vector.broadcast %cst_44 : f32 to vector<8x1xf32>
      %c0_45 = arith.constant 0 : index
      %c0_46 = arith.constant 0 : index
      %67 = vector.load %arg11[%c0_45, %c0_46] : memref<8x1xf32, #tpu.memory_space<vmem>>, vector<8x1xf32>
      tpu.vector_store %arg11[%c0_45, %c0_46], %66 {strides = array<i32>} : memref<8x1xf32, #tpu.memory_space<vmem>>, vector<8x1xf32>,
    } else {
    }
    %c0 = arith.constant 0 : index
    %c0_1 = arith.constant 0 : index
    %3 = vector.load %arg2[%c0, %c0_1] : memref<8x64xf32, #tpu.memory_space<vmem>>, vector<8x64xf32>
    %c0_2 = arith.constant 0 : index
    %c0_3 = arith.constant 0 : index
    %4 = vector.load %arg3[%c0_2, %c0_3] : memref<8x64xf32, #tpu.memory_space<vmem>>, vector<8x64xf32>
    %5 = math.absf %3 : vector<8x64xf32>
    %cst = arith.constant 0.000000e+00 : f32
    %6 = vector.broadcast %cst : f32 to vector<8x64xf32>
    %7 = arith.subf %6, %5 : vector<8x64xf32>
    %8 = math.exp %7 : vector<8x64xf32>
    %cst_4 = arith.constant 1.000000e+00 : f32
    %9 = vector.broadcast %cst_4 : f32 to vector<8x64xf32>
    %10 = arith.addf %9, %8 : vector<8x64xf32>
    %cst_5 = arith.constant 0.000000e+00 : f32
    %11 = vector.broadcast %cst_5 : f32 to vector<8x64xf32>
    %12 = arith.subf %11, %3 : vector<8x64xf32>
    %cst_6 = arith.constant 0.000000e+00 : f32
    %13 = vector.broadcast %cst_6 : f32 to vector<8x64xf32>
    %14 = arith.maximumf %12, %13 : vector<8x64xf32>
    %15 = math.log %10 : vector<8x64xf32>
    %16 = arith.addf %14, %15 : vector<8x64xf32>
    %cst_7 = arith.constant 1.000000e+00 : f32
    %17 = vector.broadcast %cst_7 : f32 to vector<8x64xf32>
    %18 = arith.subf %17, %4 : vector<8x64xf32>
    %19 = arith.mulf %18, %3 : vector<8x64xf32>
    %cst_8 = arith.constant 2.000000e+00 : f32
    %20 = vector.broadcast %cst_8 : f32 to vector<8x64xf32>
    %21 = arith.mulf %20, %4 : vector<8x64xf32>
    %cst_9 = arith.constant 1.000000e+00 : f32
    %22 = vector.broadcast %cst_9 : f32 to vector<8x64xf32>
    %23 = arith.addf %22, %21 : vector<8x64xf32>
    %24 = arith.mulf %23, %16 : vector<8x64xf32>
    %25 = arith.addf %19, %24 : vector<8x64xf32>
    %26 = tpu.reciprocal %10 {approx = true} : vector<8x64xf32> -> vector<8x64xf32>
    %27 = arith.mulf %10, %26 : vector<8x64xf32>
    %cst_10 = arith.constant 2.000000e+00 : f32
    %28 = vector.broadcast %cst_10 : f32 to vector<8x64xf32>
    %29 = arith.subf %28, %27 : vector<8x64xf32>
    %30 = arith.mulf %26, %29 : vector<8x64xf32>
    %cst_11 = arith.constant 0.000000e+00 : f32
    %31 = vector.broadcast %cst_11 : f32 to vector<8x64xf32>
    %32 = arith.cmpf oge, %3, %31 : vector<8x64xf32>
    %cst_12 = arith.constant 1.000000e+00 : f32
    %33 = vector.broadcast %cst_12 : f32 to vector<8x64xf32>
    %34 = arith.select %32, %33, %8 : vector<8x64xi1>, vector<8x64xf32>
    %35 = arith.mulf %34, %30 : vector<8x64xf32>
    %c0_13 = arith.constant 0 : index
    %c0_14 = arith.constant 0 : index
    %36 = vector.load %arg8[%c0_13, %c0_14] : memref<8x1xf32, #tpu.memory_space<vmem>>, vector<8x1xf32>
    %cst_15 = arith.constant dense<0.000000e+00> : vector<8xf32>
    %37 = vector.multi_reduction <add>, %25, %cst_15 [1] : vector<8x64xf32> to vector<8xf32>
    %38 = vector.shape_cast %37 : vector<8xf32> to vector<8x1xf32>
    %39 = arith.addf %36, %38 : vector<8x1xf32>
    %c0_16 = arith.constant 0 : index
    %c0_17 = arith.constant 0 : index
    %40 = vector.load %arg8[%c0_16, %c0_17] : memref<8x1xf32, #tpu.memory_space<vmem>>, vector<8x1xf32>
    tpu.vector_store %arg8[%c0_16, %c0_17], %39 {strides = array<i32>} : memref<8x1xf32, #tpu.memory_space<vmem>>, vector<8x1xf32>,
    %c0_18 = arith.constant 0 : index
    %c0_19 = arith.constant 0 : index
    %41 = vector.load %arg9[%c0_18, %c0_19] : memref<8x1xf32, #tpu.memory_space<vmem>>, vector<8x1xf32>
    %42 = arith.mulf %35, %4 : vector<8x64xf32>
    %cst_20 = arith.constant dense<0.000000e+00> : vector<8xf32>
    %43 = vector.multi_reduction <add>, %42, %cst_20 [1] : vector<8x64xf32> to vector<8xf32>
    %44 = vector.shape_cast %43 : vector<8xf32> to vector<8x1xf32>
    %45 = arith.addf %41, %44 : vector<8x1xf32>
    %c0_21 = arith.constant 0 : index
    %c0_22 = arith.constant 0 : index
    %46 = vector.load %arg9[%c0_21, %c0_22] : memref<8x1xf32, #tpu.memory_space<vmem>>, vector<8x1xf32>
    tpu.vector_store %arg9[%c0_21, %c0_22], %45 {strides = array<i32>} : memref<8x1xf32, #tpu.memory_space<vmem>>, vector<8x1xf32>,
    %c0_23 = arith.constant 0 : index
    %c0_24 = arith.constant 0 : index
    %47 = vector.load %arg10[%c0_23, %c0_24] : memref<8x1xf32, #tpu.memory_space<vmem>>, vector<8x1xf32>
    %cst_25 = arith.constant dense<0.000000e+00> : vector<8xf32>
    %48 = vector.multi_reduction <add>, %35, %cst_25 [1] : vector<8x64xf32> to vector<8xf32>
    %49 = vector.shape_cast %48 : vector<8xf32> to vector<8x1xf32>
    %50 = arith.addf %47, %49 : vector<8x1xf32>
    %c0_26 = arith.constant 0 : index
    %c0_27 = arith.constant 0 : index
    %51 = vector.load %arg10[%c0_26, %c0_27] : memref<8x1xf32, #tpu.memory_space<vmem>>, vector<8x1xf32>
    tpu.vector_store %arg10[%c0_26, %c0_27], %50 {strides = array<i32>} : memref<8x1xf32, #tpu.memory_space<vmem>>, vector<8x1xf32>,
    %c0_28 = arith.constant 0 : index
    %c0_29 = arith.constant 0 : index
    %52 = vector.load %arg11[%c0_28, %c0_29] : memref<8x1xf32, #tpu.memory_space<vmem>>, vector<8x1xf32>
    %cst_30 = arith.constant dense<0.000000e+00> : vector<8xf32>
    %53 = vector.multi_reduction <add>, %4, %cst_30 [1] : vector<8x64xf32> to vector<8xf32>
    %54 = vector.shape_cast %53 : vector<8xf32> to vector<8x1xf32>
    %55 = arith.addf %52, %54 : vector<8x1xf32>
    %c0_31 = arith.constant 0 : index
    %c0_32 = arith.constant 0 : index
    %56 = vector.load %arg11[%c0_31, %c0_32] : memref<8x1xf32, #tpu.memory_space<vmem>>, vector<8x1xf32>
    tpu.vector_store %arg11[%c0_31, %c0_32], %55 {strides = array<i32>} : memref<8x1xf32, #tpu.memory_space<vmem>>, vector<8x1xf32>,
    %c0_i32_33 = arith.constant 0 : i32
    %57 = arith.cmpi eq, %arg1, %c0_i32_33 : i32
    %58 = arith.extui %57 : i1 to i32
    %c0_i32_34 = arith.constant 0 : i32
    %59 = arith.cmpi ne, %58, %c0_i32_34 : i32
    scf.if %59 {
      %c0_35 = arith.constant 0 : index
      %c0_36 = arith.constant 0 : index
      %60 = vector.load %arg8[%c0_35, %c0_36] : memref<8x1xf32, #tpu.memory_space<vmem>>, vector<8x1xf32>
      %c0_37 = arith.constant 0 : index
      %c0_38 = arith.constant 0 : index
      %c0_39 = arith.constant 0 : index
      %61 = vector.load %arg4[%c0_37, %c0_38, %c0_39] : memref<1x8x1xf32, #tpu.memory_space<vmem>>, vector<1x8x1xf32>
      %62 = vector.shape_cast %61 : vector<1x8x1xf32> to vector<8x1xf32>
      %63 = vector.shape_cast %60 : vector<8x1xf32> to vector<1x8x1xf32>
      tpu.vector_store %arg4[%c0_37, %c0_38, %c0_39], %63 {strides = array<i32>} : memref<1x8x1xf32, #tpu.memory_space<vmem>>, vector<1x8x1xf32>,
      %c0_40 = arith.constant 0 : index
      %c0_41 = arith.constant 0 : index
      %64 = vector.load %arg9[%c0_40, %c0_41] : memref<8x1xf32, #tpu.memory_space<vmem>>, vector<8x1xf32>
      %c0_42 = arith.constant 0 : index
      %c0_43 = arith.constant 0 : index
      %c0_44 = arith.constant 0 : index
      %65 = vector.load %arg5[%c0_42, %c0_43, %c0_44] : memref<1x8x1xf32, #tpu.memory_space<vmem>>, vector<1x8x1xf32>
      %66 = vector.shape_cast %65 : vector<1x8x1xf32> to vector<8x1xf32>
      %67 = vector.shape_cast %64 : vector<8x1xf32> to vector<1x8x1xf32>
      tpu.vector_store %arg5[%c0_42, %c0_43, %c0_44], %67 {strides = array<i32>} : memref<1x8x1xf32, #tpu.memory_space<vmem>>, vector<1x8x1xf32>,
      %c0_45 = arith.constant 0 : index
      %c0_46 = arith.constant 0 : index
      %68 = vector.load %arg10[%c0_45, %c0_46] : memref<8x1xf32, #tpu.memory_space<vmem>>, vector<8x1xf32>
      %c0_47 = arith.constant 0 : index
      %c0_48 = arith.constant 0 : index
      %c0_49 = arith.constant 0 : index
      %69 = vector.load %arg6[%c0_47, %c0_48, %c0_49] : memref<1x8x1xf32, #tpu.memory_space<vmem>>, vector<1x8x1xf32>
      %70 = vector.shape_cast %69 : vector<1x8x1xf32> to vector<8x1xf32>
      %71 = vector.shape_cast %68 : vector<8x1xf32> to vector<1x8x1xf32>
      tpu.vector_store %arg6[%c0_47, %c0_48, %c0_49], %71 {strides = array<i32>} : memref<1x8x1xf32, #tpu.memory_space<vmem>>, vector<1x8x1xf32>,
      %c0_50 = arith.constant 0 : index
      %c0_51 = arith.constant 0 : index
      %72 = vector.load %arg11[%c0_50, %c0_51] : memref<8x1xf32, #tpu.memory_space<vmem>>, vector<8x1xf32>
      %c0_52 = arith.constant 0 : index
      %c0_53 = arith.constant 0 : index
      %c0_54 = arith.constant 0 : index
      %73 = vector.load %arg7[%c0_52, %c0_53, %c0_54] : memref<1x8x1xf32, #tpu.memory_space<vmem>>, vector<1x8x1xf32>
      %74 = vector.shape_cast %73 : vector<1x8x1xf32> to vector<8x1xf32>
      %75 = vector.shape_cast %72 : vector<8x1xf32> to vector<1x8x1xf32>
      tpu.vector_store %arg7[%c0_52, %c0_53, %c0_54], %75 {strides = array<i32>} : memref<1x8x1xf32, #tpu.memory_space<vmem>>, vector<1x8x1xf32>,
    } else {
    }
    return
  }
  func.func @transform_0(%arg0: i32, %arg1: i32) -> (i32, i32) {
    %c1_i32 = arith.constant 1 : i32
    %0 = arith.muli %arg0, %c1_i32 : i32
    %1 = arith.addi %0, %arg1 : i32
    %c0_i32 = arith.constant 0 : i32
    %c0_i32_0 = arith.constant 0 : i32
    return %c0_i32, %1 : i32, i32
  }
  func.func @transform_1(%arg0: i32, %arg1: i32) -> (i32, i32) {
    %c1_i32 = arith.constant 1 : i32
    %0 = arith.muli %arg0, %c1_i32 : i32
    %1 = arith.addi %0, %arg1 : i32
    %c0_i32 = arith.constant 0 : i32
    %c0_i32_0 = arith.constant 0 : i32
    return %c0_i32, %1 : i32, i32
  }
  func.func @transform_2(%arg0: i32, %arg1: i32) -> (i32, i32, i32) {
    %c0_i32 = arith.constant 0 : i32
    %c0_i32_0 = arith.constant 0 : i32
    %c0_i32_1 = arith.constant 0 : i32
    return %arg0, %c0_i32, %c0_i32_0 : i32, i32, i32
  }
  func.func @transform_3(%arg0: i32, %arg1: i32) -> (i32, i32, i32) {
    %c0_i32 = arith.constant 0 : i32
    %c0_i32_0 = arith.constant 0 : i32
    %c0_i32_1 = arith.constant 0 : i32
    return %arg0, %c0_i32, %c0_i32_0 : i32, i32, i32
  }
  func.func @transform_4(%arg0: i32, %arg1: i32) -> (i32, i32, i32) {
    %c0_i32 = arith.constant 0 : i32
    %c0_i32_0 = arith.constant 0 : i32
    %c0_i32_1 = arith.constant 0 : i32
    return %arg0, %c0_i32, %c0_i32_0 : i32, i32, i32
  }
  func.func @transform_5(%arg0: i32, %arg1: i32) -> (i32, i32, i32) {
    %c0_i32 = arith.constant 0 : i32
    %c0_i32_0 = arith.constant 0 : i32
    %c0_i32_1 = arith.constant 0 : i32
    return %arg0, %c0_i32, %c0_i32_0 : i32, i32, i32
  }
}

</mosaic_0001>

<bundles_post_ra>
// kernel: tpu_custom_call.1
= control target key start
LH: loop header
LB: loop body
LE: loop exit
PB: predicated region body
PF: predicated region fallthrough
CT: control target
= control target key end

     0   :  { %11 = vsyncpa [#allocation7], 0  ;;  %s275_s0 = inlined_call_operand.hbm [shape: f32[8,64], index: 0, kind: input, shape index: {}]   ;;  %s276_s1 = inlined_call_operand.hbm [shape: f32[8,64], index: 1, kind: input, shape index: {}]   ;;  %s277_s2 = inlined_call_operand.vmem [shape: f32[1,8,1], index: 2, kind: output, shape index: {0}]   ;;  %s278_s3 = inlined_call_operand.vmem [shape: f32[1,8,1], index: 3, kind: output, shape index: {1}]   ;;  %s279_s4 = inlined_call_operand.vmem [shape: f32[1,8,1], index: 4, kind: output, shape index: {2}]   ;;  %s280_s5 = inlined_call_operand.vmem [shape: f32[1,8,1], index: 5, kind: output, shape index: {3}]  }
   0x1   :  { %12 = vsyncpa [#allocation9], 0  ;;  %s194_s18 = smov [#allocation6]   ;;  %s195_s20 = smov [#allocation8]  }
   0x2   :  { %s22_s19 = sshll.u32 %s194_s18, 4  ;;  %s35_s21 = sshll.u32 %s195_s20, 4  ;;  %s23_s19 = int_to_ptr.vmem [resolvable:$true] %s22_s19  ;;  %s36_s21 = int_to_ptr.vmem [resolvable:$true] %s35_s21 }
   0x3   :  { %s146_s24 = scalar_lea.hbm %s275_s0, 128 }
   0x4   :  { %p147_p0 = scmp.ne.s32.totalorder %s275_s0, %s146_s24  ;;  %p150_p1 = scmp.lt.u32.totalorder %s146_s24, %s275_s0 }
   0x6   :  { %p152_p2 = pnand %p150_p1, %p147_p0 }
   0x8   :  { %155 = shalt.err (!%p152_p2)
}
   0x9   :  { %s156_s29 = scalar_lea.vmem %s23_s19, 128  ;;  %p161_p4 = scmp.lt.s32.totalorder %s23_s19, %s23_s19 }
   0xa   :  { %p157_p3 = scmp.ne.s32.totalorder %s23_s19, %s156_s29  ;;  %p162_p5 = scmp.lt.s32.totalorder %s156_s29, %s156_s29 }
   0xc   :  { %p163_p6 = por %p162_p5, %p161_p4 }
   0xe   :  { %p164_p7 = pnand %p163_p6, %p157_p3 }
  0x10   :  { %167 = shalt.err (!%p164_p7)
}
  0x11   :  { %25 = dma.hbm_to_vmem [thread:$0]  %s275_s0, 128, %s23_s19, [#allocation7]  }
  0x12   :  { %s168_s9 = scalar_lea.hbm %s276_s1, 128 }
  0x13   :  { %p169_p8 = scmp.ne.s32.totalorder %s276_s1, %s168_s9  ;;  %p172_p9 = scmp.lt.u32.totalorder %s168_s9, %s276_s1 }
  0x15   :  { %p174_p10 = pnand %p172_p9, %p169_p8 }
  0x17   :  { %177 = shalt.err (!%p174_p10)
}
  0x18   :  { %s178_s14 = scalar_lea.vmem %s36_s21, 128  ;;  %p183_p12 = scmp.lt.s32.totalorder %s36_s21, %s36_s21 }
  0x19   :  { %p179_p11 = scmp.ne.s32.totalorder %s36_s21, %s178_s14  ;;  %p184_p13 = scmp.lt.s32.totalorder %s178_s14, %s178_s14 }
  0x1b   :  { %p185_p0 = por %p184_p13, %p183_p12 }
  0x1d   :  { %p186_p1 = pnand %p185_p0, %p179_p11 }
  0x1f   :  { %189 = shalt.err (!%p186_p1)
}
  0x20   :  { %38 = dma.hbm_to_vmem [thread:$0]  %s276_s1, 128, %s36_s21, [#allocation9]  }
  0x21   :  { %190 = dma.done.wait [#allocation7], 128  }
  0x22   :  { %191 = vsyncadd [#allocation7], 4294967168 }
  0x23   :  { %192 = dma.done.wait [#allocation9], 128  }
  0x24   :  { %193 = vsyncadd [#allocation9], 4294967168  ;;  %vm51_vm0 = vcmask 7168   ;;  %v196_v0 = vmov 0.0   ;;  %v56_v1 = vld [vmem:[#allocation6] sm:$0xff]  ;;  %v57_v7 = vld [vmem:[#allocation8] sm:$0xff] }
  0x25   :  { %54 = vst.msk [vmem:[#allocation4] sm:$0xff] %vm51_vm0, %v196_v0  ;;  %52 = vst.msk [vmem:[#allocation2] sm:$0xff] %vm51_vm0, %v196_v0  ;;  %v58_v2 = vand.u32 2147483647, %v56_v1  ;;  %v63_v8 = vsub.f32 0.0, %v56_v1  ;;  %v70_v9 = vmul.f32 2.0, %v57_v7 }
  0x26   :  { %53 = vst.msk [vmem:[#allocation3] sm:$0xff] %vm51_vm0, %v196_v0  ;;  %55 = vst.msk [vmem:[#allocation5] sm:$0xff] %vm51_vm0, %v196_v0  ;;  %v68_v12 = vsub.f32 1.0, %v57_v7  ;;  %vm78_vm1 = vcmp.ge.f32.partialorder %v56_v1, 0.0  ;;  %vm82_vm2 = vcmask 523264  }
  0x27   :  { %v59_v3 = vsub.f32 0.0, %v58_v2  ;;  %v64_v11 = vmax.f32 %v63_v8, 0.0  ;;  %v71_v16 = vadd.f32 1.0, %v70_v9  ;;  %v103_v28 = vsel %vm82_vm2, %v57_v7, 0.0 }
  0x28   :  { %v69_v20 = vmul.f32 %v68_v12, %v56_v1 }
  0x29   :  { %v60_v4 = vmul.f32 1.442695, %v59_v3 }
  0x2b   :  { %140 = vpow2.f32 %v60_v4 }
  0x2c   :  { %v96_v30 = vld [vmem:[#allocation4] sm:$0xff]  ;;  %v81_v31 = vld [vmem:[#allocation2] sm:$0xff] }
  0x2d   :  { %v102_v36 = vld [vmem:[#allocation5] sm:$0xff]  ;;  %v89_v37 = vld [vmem:[#allocation3] sm:$0xff] }
  0x35   :  { %v141_v5 = vpop.eup %140 }
  0x36   :  { %v62_v6 = vadd.f32 1.0, %v141_v5  ;;  %v79_v18 = vsel %vm78_vm1, 1.0, %v141_v5 }
  0x38   :  { %142 = vrcp.f32 %v62_v6 }
  0x39   :  { %144 = vlog2.f32 %v62_v6 }
  0x42   :  { %v143_v10 = vpop.eup %142 }
  0x43   :  { %v145_v13 = vpop.eup %144  ;;  %v75_v14 = vmul.f32 %v143_v10, %v62_v6 }
  0x44   :  { %v66_v15 = vmul.f32 0.6931472, %v145_v13 }
  0x45   :  { %v76_v17 = vsub.f32 2.0, %v75_v14 }
  0x46   :  { %v67_v19 = vadd.f32 %v66_v15, %v64_v11 }
  0x47   :  { %v77_v21 = vmul.f32 %v143_v10, %v76_v17 }
  0x48   :  { %v72_v22 = vmul.f32 %v71_v16, %v67_v19 }
  0x49   :  { %v80_v23 = vmul.f32 %v79_v18, %v77_v21 }
  0x4a   :  { %v73_v24 = vadd.f32 %v72_v22, %v69_v20 }
  0x4b   :  { %v97_v25 = vsel %vm82_vm2, %v80_v23, 0.0  ;;  %v90_v26 = vmul.f32 %v80_v23, %v57_v7 }
  0x4c   :  { %98 = vadd.xlane.f32.xlu1 %v97_v25  ;;  %v83_v27 = vsel %vm82_vm2, %v73_v24, 0.0 }
  0x4d   :  { %84 = vadd.xlane.f32.xlu0 %v83_v27  ;;  %v91_v29 = vsel %vm82_vm2, %v90_v26, 0.0 }
  0x50   :  { %104 = vadd.xlane.f32.xlu1 %v103_v28 }
  0x51   :  { %92 = vadd.xlane.f32.xlu0 %v91_v29 }
  0xd9   :  { %v99_v32 = vpop.xlane.xlu1 %98 }
  0xda   :  { %v100_v33 = vadd.f32 %v99_v32, %v96_v30  ;;  %v85_v34 = vpop.xlane.xlu0 %84 }
  0xdb   :  { %v86_v35 = vadd.f32 %v85_v34, %v81_v31 }
  0xdc   :  { %101 = vst.msk [vmem:[#allocation4] sm:$0xff] %vm51_vm0, %v100_v33 }
  0xdd   :  { %88 = vst.msk [vmem:[#allocation2] sm:$0xff] %vm51_vm0, %v86_v35  ;;  %v105_v38 = vpop.xlane.xlu1 %104 }
  0xde   :  { %v106_v39 = vadd.f32 %v105_v38, %v102_v36  ;;  %v93_v40 = vpop.xlane.xlu0 %92 }
  0xdf   :  { %v94_v41 = vadd.f32 %v93_v40, %v89_v37 }
  0xe0   :  { %107 = vst.msk [vmem:[#allocation5] sm:$0xff] %vm51_vm0, %v106_v39 }
  0xe1   :  { %95 = vst.msk [vmem:[#allocation3] sm:$0xff] %vm51_vm0, %v94_v41 }
  0xe3   :  { %v115_v42 = vld [vmem:[#allocation4] sm:$0xff] }
  0xe4   :  { %116 = vst.msk [vmem:[%s279_s4] sm:$0xff] %vm51_vm0, %v115_v42  ;;  %v111_v43 = vld [vmem:[#allocation2] sm:$0xff] }
  0xe5   :  { %112 = vst.msk [vmem:[%s277_s2] sm:$0xff] %vm51_vm0, %v111_v43 }
  0xe7   :  { %v117_v44 = vld [vmem:[#allocation5] sm:$0xff] }
  0xe8   :  { %118 = vst.msk [vmem:[%s280_s5] sm:$0xff] %vm51_vm0, %v117_v44  ;;  %v113_v45 = vld [vmem:[#allocation3] sm:$0xff] }
  0xe9   :  { %114 = vst.msk [vmem:[%s278_s3] sm:$0xff] %vm51_vm0, %v113_v45 }
  0xea   :  { %135 = vsyncpa [#allocation7], 1 }
  0xeb   :  { %136 = vsyncpa [#allocation9], 1 }

</bundles_post_ra>
